<compile_context>
chip_gen: v6e
topology: v6e:2x2x1
jax: 0.10.0
libtpu: 0.0.40
codegen_flags: <defaults>
</compile_context>

<pallas_src>
import functools

import jax
import jax.numpy as jnp
from jax import lax
from jax.experimental import pallas as pl
from jax.experimental.pallas import tpu as pltpu

EPS = 1e-5
CHUNK_ROWS = 64            # in-kernel compute chunk: bounds the live-vreg working set


# --------------------------- sizing helpers ---------------------------

def _vmem_limit_bytes():
    cap = None
    try:
        cap = getattr(pltpu.get_tpu_info(), "vmem_capacity_bytes", None)
    except Exception:
        cap = None
    if not cap:
        cap = 64 * 1024 * 1024          # conservative fallback (v7x physical VMEM)
    # v5e/v6e (128 MiB) -> 64 MiB scoped; v7x (64 MiB) -> ~45 MiB scoped
    return int(min(cap * 0.7, 64 * 1024 * 1024))


def _plan_tiles(n, cl, vmem_limit):
    """(bt, bs, n_pad): grid batch-tile rows, in-kernel chunk rows, padded batch rows."""
    budget = max(vmem_limit // 2, 1 << 20)           # headroom for weights / stats / scratch
    bt_cap = budget // (3 * 2 * cl * 4)              # 3 activation tiles, double-buffered, f32
    bt_cap = max(CHUNK_ROWS, min(int(bt_cap), 8192))
    bt_cap = (bt_cap // CHUNK_ROWS) * CHUNK_ROWS
    n_sub = ((n + 7) // 8) * 8                       # batch rounded up to a sublane multiple
    bt = n_sub if n_sub <= bt_cap else bt_cap
    bs = min(CHUNK_ROWS, bt)
    bt = ((bt + bs - 1) // bs) * bs                  # bt is a multiple of the chunk size
    n_pad = ((n + bt - 1) // bt) * bt
    return bt, bs, n_pad


# --------------------------- in-kernel compute ---------------------------

def _bn_conv_relu_chunk(xt, v_ref, b_ref, L, n_delta):
    """Fused-lane BN -> Conv1d(k=3, pad=1) -> ReLU on one (rows, S*L) chunk.

    BN scale is folded into the per-lane weight rows of v_ref and BN shift + conv bias into
    b_ref, so xt is the raw (un-normalized) input.  Lane j = segment*L + l; every output
    channel occupies its own L-lane segment, so a single accumulator covers all output
    channels with full-width VPU FMAs.  Segment alignment uses pltpu.roll (XLU slot).
    """
    rows, cl = xt.shape
    pos = lax.broadcasted_iota(jnp.int32, (rows, cl), 1) % L
    prev = jnp.where(pos == 0, 0.0, pltpu.roll(xt, 1, 1))          # x[l-1], zero at l == 0
    nxt = jnp.where(pos == L - 1, 0.0, pltpu.roll(xt, cl - 1, 1))  # x[l+1], zero at l == L-1
    taps = (prev, xt, nxt)

    acc = jnp.broadcast_to(b_ref[...], (rows, cl))                 # per-lane folded bias
    for d in range(n_delta):
        shift = (cl - d * L) % cl      # align input segment (seg + d) with output segment seg
        for k, t0 in enumerate(taps):
            t = t0 if shift == 0 else pltpu.roll(t0, shift, 1)
            acc = acc + v_ref[3 * d + k: 3 * d + k + 1, :] * t
    return jnp.maximum(acc, 0.0)


# ------------------------------- kernels -------------------------------

def _pass1_kernel(x_ref, v1_ref, b1_ref, h_ref, stats_ref, *, L, n_delta, bs, n_rows):
    """BN1 + conv1 + ReLU on one batch tile; per-tile BN2 sum / sum-of-squares."""
    bt, cl = x_ref.shape
    row0 = pl.program_id(0) * bt

    def chunk(xt, r):
        ht = _bn_conv_relu_chunk(xt, v1_ref, b1_ref, L, n_delta)
        # rows past the true batch (zero padding) must not pollute the BN2 statistics
        gr = row0 + r + lax.broadcasted_iota(jnp.int32, ht.shape, 0)
        hv = jnp.where(gr < n_rows, ht, 0.0)
        return ht, jnp.sum(hv, axis=0, keepdims=True), jnp.sum(hv * hv, axis=0, keepdims=True)

    if bt == bs:
        ht, s, ss = chunk(x_ref[...], 0)
        h_ref[...] = ht
    else:
        def body(i, carry):
            s_acc, ss_acc = carry
            r = pl.multiple_of(i * bs, bs)
            ht, ds_, dss = chunk(x_ref[pl.ds(r, bs), :], r)
            h_ref[pl.ds(r, bs), :] = ht
            return s_acc + ds_, ss_acc + dss

        zero = jnp.zeros((1, cl), jnp.float32)
        s, ss = lax.fori_loop(0, bt // bs, body, (zero, zero))

    stats_ref[0, 0:1, :] = s
    stats_ref[0, 1:2, :] = ss


def _pass2_kernel(h_ref, x_ref, v2_ref, b2_ref, o_ref, *, L, n_delta, bs):
    """BN2 + conv2 + ReLU + residual (original input) on one batch tile."""
    bt, cl = x_ref.shape
    if bt == bs:
        yt = _bn_conv_relu_chunk(h_ref[...], v2_ref, b2_ref, L, n_delta)
        o_ref[...] = yt + x_ref[...]
    else:
        def body(i, carry):
            r = pl.multiple_of(i * bs, bs)
            yt = _bn_conv_relu_chunk(h_ref[pl.ds(r, bs), :], v2_ref, b2_ref, L, n_delta)
            o_ref[pl.ds(r, bs), :] = yt + x_ref[pl.ds(r, bs), :]
            return carry

        lax.fori_loop(0, bt // bs, body, 0)


# ------------------------------- wrapper -------------------------------

def _fold_stage(w, cb, a, dsh, L, seg_out, seg_in, n_delta):
    """Per-lane folded weights / bias for one BN -> Conv1d(k=3, p=1) stage.

    w: (Cout, Cin, 3) PyTorch conv weight, cb: (Cout,), a/dsh: folded BN scale/shift of the
    stage input.  seg_out[c] / seg_in[c]: output / input channel held by lane segment c.
    Returns V (3*n_delta, S*L) and bias (1, S*L).
    """
    f32 = jnp.float32
    w, cb, a, dsh = (t.astype(f32) for t in (w, cb, a, dsh))
    S = seg_out.shape[0]
    wp = w * a[None, :, None]                                       # fold BN scale into weights
    seg = jnp.arange(S)
    src = (seg[None, :] + jnp.arange(n_delta)[:, None]) % S         # (n_delta, S)
    V = wp[seg_out[None, :], seg_in[src], :]                        # (n_delta, S, 3)
    V = jnp.transpose(V, (0, 2, 1))                                 # (n_delta, 3, S)
    V = jnp.repeat(V, L, axis=2).reshape(3 * n_delta, S * L)        # lane j = seg*L + l

    sk = jnp.einsum('oik,i->ok', w, dsh)                            # BN shift through the taps
    lpos = jnp.arange(L)
    bias = (cb[:, None] + sk[:, 1:2]
            + (lpos[None, :] > 0) * sk[:, 0:1]                      # k=0 tap hits zero pad at l=0
            + (lpos[None, :] < L - 1) * sk[:, 2:3])                 # k=2 tap hits zero pad at l=L-1
    bias = bias[seg_out, :].reshape(1, S * L)
    return V, bias


def block_forward(x_ncl, params):
    """x_ncl: (N, C, L) float32.  Returns (N, C, L)."""
    f32 = jnp.float32
    n, c, L = x_ncl.shape
    m = int(params["w1"].shape[0])                  # mid channels = out_channels // 2
    c_out = int(params["w2"].shape[0])
    assert c == c_out, "residual add requires in_channels == out_channels"
    assert c == 2 * m, "bottleneck layout assumes mid = channels // 2 (even channel count)"

    x = x_ncl.astype(f32)
    cl = c * L
    x2 = x.reshape(n, cl)                           # lane-dense view: lane = channel*L + pos

    # ---- BN1 batch statistics (training mode, biased variance), one pass over x ----
    cnt1 = jnp.asarray(n * L, f32)
    s1 = jnp.sum(x, axis=(0, 2))
    ss1 = jnp.sum(x * x, axis=(0, 2))
    mean1 = s1 / cnt1
    var1 = jnp.maximum(ss1 / cnt1 - mean1 * mean1, 0.0)
    inv1 = lax.rsqrt(var1 + EPS)
    g1 = params["g1"].astype(f32)
    a1 = g1 * inv1
    d1 = params["b1"].astype(f32) - mean1 * a1

    seg = jnp.arange(c)
    # pass 1: input segments hold channels 0..C-1; output segment c holds mid channel c % M,
    # i.e. h is stored with every mid channel replicated C/M times (full C*L lane width).
    v1, bias1 = _fold_stage(params["w1"], params["cb1"], a1, d1, L,
                            seg_out=seg % m, seg_in=seg, n_delta=c)

    vmem_limit = _vmem_limit_bytes()
    bt, bs, n_pad = _plan_tiles(n, cl, vmem_limit)
    if n_pad > n:
        x2 = jnp.pad(x2, ((0, n_pad - n), (0, 0)))
    n_tiles = n_pad // bt
    grid = (n_tiles,)
    cparams = pltpu.CompilerParams(dimension_semantics=("parallel",),
                                   vmem_limit_bytes=vmem_limit)

    tile_spec = pl.BlockSpec((bt, cl), lambda i: (i, 0))
    full2d = lambda shape: pl.BlockSpec(shape, lambda i: (0, 0))

    # ---- pass 1: BN1 + conv1 + ReLU, per-tile partial BN2 stats ----
    h, stats = pl.pallas_call(
        functools.partial(_pass1_kernel, L=L, n_delta=c, bs=bs, n_rows=n),
        grid=grid,
        in_specs=[tile_spec, full2d((3 * c, cl)), full2d((1, cl))],
        out_specs=[tile_spec, pl.BlockSpec((1, 2, cl), lambda i: (i, 0, 0))],
        out_shape=[jax.ShapeDtypeStruct((n_pad, cl), f32),
                   jax.ShapeDtypeStruct((n_tiles, 2, cl), f32)],
        compiler_params=cparams,
    )(x2, v1, bias1)

    # ---- BN2 statistics from the per-tile partial sums (mid channels replicated r times) ----
    r = c // m
    st = jnp.sum(stats, axis=0)                                     # (2, C*L)
    cnt2 = jnp.asarray(n * L * r, f32)
    s2 = jnp.sum(st[0].reshape(r, m, L), axis=(0, 2))
    ss2 = jnp.sum(st[1].reshape(r, m, L), axis=(0, 2))
    mean2 = s2 / cnt2
    var2 = jnp.maximum(ss2 / cnt2 - mean2 * mean2, 0.0)
    inv2 = lax.rsqrt(var2 + EPS)
    g2 = params["g2"].astype(f32)
    a2 = g2 * inv2
    d2 = params["b2"].astype(f32) - mean2 * a2

    # pass 2: input segments hold mid channel (seg % M); output segments hold channels 0..C-1.
    v2, bias2 = _fold_stage(params["w2"], params["cb2"], a2, d2, L,
                            seg_out=seg, seg_in=seg % m, n_delta=m)

    out = pl.pallas_call(
        functools.partial(_pass2_kernel, L=L, n_delta=m, bs=bs),
        grid=grid,
        in_specs=[tile_spec, tile_spec, full2d((3 * m, cl)), full2d((1, cl))],
        out_specs=tile_spec,
        out_shape=jax.ShapeDtypeStruct((n_pad, cl), f32),
        compiler_params=cparams,
    )(h, x2, v2, bias2)

    return out[:n].reshape(n, c, L)


# ----------------------------- pure-JAX reference -----------------------------

def block_reference(x, params):
    def bn(t, g, b):
        mean = t.mean(axis=(0, 2), keepdims=True)
        var = ((t - mean) ** 2).mean(axis=(0, 2), keepdims=True)
        return (t - mean) / jnp.sqrt(var + EPS) * g[None, :, None] + b[None, :, None]

    def conv(t, w, b):
        y = lax.conv_general_dilated(t, w, window_strides=(1,), padding=[(1, 1)],
                                     dimension_numbers=("NCH", "OIH", "NCH"))
        return y + b[None, :, None]

    h = jax.nn.relu(conv(bn(x, params["g1"], params["b1"]), params["w1"], params["cb1"]))
    return jax.nn.relu(conv(bn(h, params["g2"], params["b2"]), params["w2"], params["cb2"])) + x


if __name__ == "__main__":
    # small shapes consistent with the module: batch=2, in=out=8 channels, seq=16
    N, C, L = 2, 8, 16
    C_MID = C // 2

    key = jax.random.PRNGKey(0)
    ks = jax.random.split(key, 9)
    params = {
        # Conv1d weights in PyTorch layout (out, in, k)
        "w1": jax.random.normal(ks[0], (C_MID, C, 3), jnp.float32) * 0.2,
        "cb1": jax.random.normal(ks[1], (C_MID,), jnp.float32) * 0.1,
        "w2": jax.random.normal(ks[2], (C, C_MID, 3), jnp.float32) * 0.2,
        "cb2": jax.random.normal(ks[3], (C,), jnp.float32) * 0.1,
        # BatchNorm affine params (PyTorch init is gamma=1, beta=0; perturb to exercise the path)
        "g1": 1.0 + 0.1 * jax.random.normal(ks[4], (C,), jnp.float32),
        "b1": 0.1 * jax.random.normal(ks[5], (C,), jnp.float32),
        "g2": 1.0 + 0.1 * jax.random.normal(ks[6], (C_MID,), jnp.float32),
        "b2": 0.1 * jax.random.normal(ks[7], (C_MID,), jnp.float32),
    }
    x = jax.random.normal(ks[8], (N, C, L), jnp.float32)

    out = jax.block_until_ready(block_forward(x, params))
    ref = jax.block_until_ready(block_reference(x, params))

    assert out.shape == (N, C, L)
    max_err = float(jnp.max(jnp.abs(out - ref)))
    assert max_err < 3e-4, f"max err {max_err}"
    print("KERNEL_OK")
</pallas_src>

<mosaic_0001>
module attributes {stable_mosaic.version = 11 : i64} {
  func.func @_pass1_kernel(%arg0: i32, %arg1: memref<8x128xf32, #tpu.memory_space<vmem>>, %arg2: memref<24x128xf32, #tpu.memory_space<vmem>>, %arg3: memref<1x128xf32, #tpu.memory_space<vmem>>, %arg4: memref<8x128xf32, #tpu.memory_space<vmem>>, %arg5: memref<1x2x128xf32, #tpu.memory_space<vmem>>) attributes {dimension_semantics = [#tpu.dimension_semantics<parallel>], iteration_bounds = array<i64: 1>, scalar_prefetch = 0 : i64, scratch_operands = 0 : i64, tpu.core_type = #tpu.core_type<tc>, window_params = [{transform_indices = @transform_0, window_bounds = array<i64: 8, 128>}, {pipeline_mode = #tpu.pipeline_mode<synchronous>, transform_indices = @transform_1, window_bounds = array<i64: 24, 128>}, {pipeline_mode = #tpu.pipeline_mode<synchronous>, transform_indices = @transform_2, window_bounds = array<i64: 1, 128>}, {transform_indices = @transform_3, window_bounds = array<i64: 8, 128>}, {transform_indices = @transform_4, window_bounds = array<i64: 1, 2, 128>}]} {
    %c8_i32 = arith.constant 8 : i32
    %0 = arith.muli %arg0, %c8_i32 : i32
    %c0 = arith.constant 0 : index
    %c0_0 = arith.constant 0 : index
    %1 = vector.load %arg1[%c0, %c0_0] : memref<8x128xf32, #tpu.memory_space<vmem>>, vector<8x128xf32>
    %2 = tpu.iota {dimensions = array<i32: 1>} : vector<8x128xi32>
    %c16_i32 = arith.constant 16 : i32
    %c0_i32 = arith.constant 0 : i32
    %3 = arith.cmpi eq, %c16_i32, %c0_i32 : i32
    %c1_i32 = arith.constant 1 : i32
    %4 = arith.select %3, %c1_i32, %c16_i32 : i32
    %5 = vector.broadcast %4 : i32 to vector<8x128xi32>
    %6 = arith.remsi %2, %5 : vector<8x128xi32>
    %c0_i32_1 = arith.constant 0 : i32
    %7 = vector.broadcast %c0_i32_1 : i32 to vector<8x128xi32>
    %8 = arith.cmpi ne, %6, %7 : vector<8x128xi32>
    %c0_i32_2 = arith.constant 0 : i32
    %9 = vector.broadcast %c0_i32_2 : i32 to vector<8x128xi32>
    %10 = arith.cmpi slt, %6, %9 : vector<8x128xi32>
    %c0_i32_3 = arith.constant 0 : i32
    %11 = arith.cmpi slt, %4, %c0_i32_3 : i32
    %12 = vector.broadcast %11 : i1 to vector<8x128xi1>
    %13 = vector.broadcast %12 : vector<8x128xi1> to vector<8x128xi1>
    %14 = arith.xori %10, %13 : vector<8x128xi1>
    %15 = arith.andi %14, %8 : vector<8x128xi1>
    %16 = vector.broadcast %4 : i32 to vector<8x128xi32>
    %17 = arith.addi %6, %16 : vector<8x128xi32>
    %18 = arith.select %15, %17, %6 : vector<8x128xi1>, vector<8x128xi32>
    %c0_i32_4 = arith.constant 0 : i32
    %19 = vector.broadcast %c0_i32_4 : i32 to vector<8x128xi32>
    %20 = arith.cmpi eq, %18, %19 : vector<8x128xi32>
    %c1_i32_5 = arith.constant 1 : i32
    %21 = tpu.dynamic_rotate %1 by %c1_i32_5 dim 1 : vector<8x128xf32>, i32 -> vector<8x128xf32>
    %cst = arith.constant 0.000000e+00 : f32
    %22 = vector.broadcast %cst : f32 to vector<8x128xf32>
    %23 = arith.select %20, %22, %21 : vector<8x128xi1>, vector<8x128xf32>
    %c15_i32 = arith.constant 15 : i32
    %24 = vector.broadcast %c15_i32 : i32 to vector<8x128xi32>
    %25 = arith.cmpi eq, %18, %24 : vector<8x128xi32>
    %c127_i32 = arith.constant 127 : i32
    %26 = tpu.dynamic_rotate %1 by %c127_i32 dim 1 : vector<8x128xf32>, i32 -> vector<8x128xf32>
    %cst_6 = arith.constant 0.000000e+00 : f32
    %27 = vector.broadcast %cst_6 : f32 to vector<8x128xf32>
    %28 = arith.select %25, %27, %26 : vector<8x128xi1>, vector<8x128xf32>
    %c0_7 = arith.constant 0 : index
    %c0_8 = arith.constant 0 : index
    %29 = vector.load %arg3[%c0_7, %c0_8] : memref<1x128xf32, #tpu.memory_space<vmem>>, vector<1x128xf32>
    %30 = vector.shape_cast %29 : vector<1x128xf32> to vector<1x128xf32>
    %31 = vector.broadcast %30 : vector<1x128xf32> to vector<8x128xf32>
    %c0_9 = arith.constant 0 : index
    %c0_10 = arith.constant 0 : index
    %32 = vector.load %arg2[%c0_9, %c0_10] : memref<24x128xf32, #tpu.memory_space<vmem>>, vector<1x128xf32>
    %33 = vector.broadcast %32 : vector<1x128xf32> to vector<8x128xf32>
    %34 = arith.mulf %33, %23 : vector<8x128xf32>
    %35 = arith.addf %31, %34 : vector<8x128xf32>
    %c1 = arith.constant 1 : index
    %c0_11 = arith.constant 0 : index
    %36 = vector.load %arg2[%c1, %c0_11] : memref<24x128xf32, #tpu.memory_space<vmem>>, vector<1x128xf32>
    %37 = vector.broadcast %36 : vector<1x128xf32> to vector<8x128xf32>
    %38 = arith.mulf %37, %1 : vector<8x128xf32>
    %39 = arith.addf %35, %38 : vector<8x128xf32>
    %c2 = arith.constant 2 : index
    %c0_12 = arith.constant 0 : index
    %40 = vector.load %arg2[%c2, %c0_12] : memref<24x128xf32, #tpu.memory_space<vmem>>, vector<1x128xf32>
    %41 = vector.broadcast %40 : vector<1x128xf32> to vector<8x128xf32>
    %42 = arith.mulf %41, %28 : vector<8x128xf32>
    %43 = arith.addf %39, %42 : vector<8x128xf32>
    %c112_i32 = arith.constant 112 : i32
    %44 = tpu.dynamic_rotate %23 by %c112_i32 dim 1 : vector<8x128xf32>, i32 -> vector<8x128xf32>
    %c3 = arith.constant 3 : index
    %c0_13 = arith.constant 0 : index
    %45 = vector.load %arg2[%c3, %c0_13] : memref<24x128xf32, #tpu.memory_space<vmem>>, vector<1x128xf32>
    %46 = vector.broadcast %45 : vector<1x128xf32> to vector<8x128xf32>
    %47 = arith.mulf %46, %44 : vector<8x128xf32>
    %48 = arith.addf %43, %47 : vector<8x128xf32>
    %c112_i32_14 = arith.constant 112 : i32
    %49 = tpu.dynamic_rotate %1 by %c112_i32_14 dim 1 : vector<8x128xf32>, i32 -> vector<8x128xf32>
    %c4 = arith.constant 4 : index
    %c0_15 = arith.constant 0 : index
    %50 = vector.load %arg2[%c4, %c0_15] : memref<24x128xf32, #tpu.memory_space<vmem>>, vector<1x128xf32>
    %51 = vector.broadcast %50 : vector<1x128xf32> to vector<8x128xf32>
    %52 = arith.mulf %51, %49 : vector<8x128xf32>
    %53 = arith.addf %48, %52 : vector<8x128xf32>
    %c112_i32_16 = arith.constant 112 : i32
    %54 = tpu.dynamic_rotate %28 by %c112_i32_16 dim 1 : vector<8x128xf32>, i32 -> vector<8x128xf32>
    %c5 = arith.constant 5 : index
    %c0_17 = arith.constant 0 : index
    %55 = vector.load %arg2[%c5, %c0_17] : memref<24x128xf32, #tpu.memory_space<vmem>>, vector<1x128xf32>
    %56 = vector.broadcast %55 : vector<1x128xf32> to vector<8x128xf32>
    %57 = arith.mulf %56, %54 : vector<8x128xf32>
    %58 = arith.addf %53, %57 : vector<8x128xf32>
    %c96_i32 = arith.constant 96 : i32
    %59 = tpu.dynamic_rotate %23 by %c96_i32 dim 1 : vector<8x128xf32>, i32 -> vector<8x128xf32>
    %c6 = arith.constant 6 : index
    %c0_18 = arith.constant 0 : index
    %60 = vector.load %arg2[%c6, %c0_18] : memref<24x128xf32, #tpu.memory_space<vmem>>, vector<1x128xf32>
    %61 = vector.broadcast %60 : vector<1x128xf32> to vector<8x128xf32>
    %62 = arith.mulf %61, %59 : vector<8x128xf32>
    %63 = arith.addf %58, %62 : vector<8x128xf32>
    %c96_i32_19 = arith.constant 96 : i32
    %64 = tpu.dynamic_rotate %1 by %c96_i32_19 dim 1 : vector<8x128xf32>, i32 -> vector<8x128xf32>
    %c7 = arith.constant 7 : index
    %c0_20 = arith.constant 0 : index
    %65 = vector.load %arg2[%c7, %c0_20] : memref<24x128xf32, #tpu.memory_space<vmem>>, vector<1x128xf32>
    %66 = vector.broadcast %65 : vector<1x128xf32> to vector<8x128xf32>
    %67 = arith.mulf %66, %64 : vector<8x128xf32>
    %68 = arith.addf %63, %67 : vector<8x128xf32>
    %c96_i32_21 = arith.constant 96 : i32
    %69 = tpu.dynamic_rotate %28 by %c96_i32_21 dim 1 : vector<8x128xf32>, i32 -> vector<8x128xf32>
    %c8 = arith.constant 8 : index
    %c0_22 = arith.constant 0 : index
    %70 = vector.load %arg2[%c8, %c0_22] : memref<24x128xf32, #tpu.memory_space<vmem>>, vector<1x128xf32>
    %71 = vector.broadcast %70 : vector<1x128xf32> to vector<8x128xf32>
    %72 = arith.mulf %71, %69 : vector<8x128xf32>
    %73 = arith.addf %68, %72 : vector<8x128xf32>
    %c80_i32 = arith.constant 80 : i32
    %74 = tpu.dynamic_rotate %23 by %c80_i32 dim 1 : vector<8x128xf32>, i32 -> vector<8x128xf32>
    %c9 = arith.constant 9 : index
    %c0_23 = arith.constant 0 : index
    %75 = vector.load %arg2[%c9, %c0_23] : memref<24x128xf32, #tpu.memory_space<vmem>>, vector<1x128xf32>
    %76 = vector.broadcast %75 : vector<1x128xf32> to vector<8x128xf32>
    %77 = arith.mulf %76, %74 : vector<8x128xf32>
    %78 = arith.addf %73, %77 : vector<8x128xf32>
    %c80_i32_24 = arith.constant 80 : i32
    %79 = tpu.dynamic_rotate %1 by %c80_i32_24 dim 1 : vector<8x128xf32>, i32 -> vector<8x128xf32>
    %c10 = arith.constant 10 : index
    %c0_25 = arith.constant 0 : index
    %80 = vector.load %arg2[%c10, %c0_25] : memref<24x128xf32, #tpu.memory_space<vmem>>, vector<1x128xf32>
    %81 = vector.broadcast %80 : vector<1x128xf32> to vector<8x128xf32>
    %82 = arith.mulf %81, %79 : vector<8x128xf32>
    %83 = arith.addf %78, %82 : vector<8x128xf32>
    %c80_i32_26 = arith.constant 80 : i32
    %84 = tpu.dynamic_rotate %28 by %c80_i32_26 dim 1 : vector<8x128xf32>, i32 -> vector<8x128xf32>
    %c11 = arith.constant 11 : index
    %c0_27 = arith.constant 0 : index
    %85 = vector.load %arg2[%c11, %c0_27] : memref<24x128xf32, #tpu.memory_space<vmem>>, vector<1x128xf32>
    %86 = vector.broadcast %85 : vector<1x128xf32> to vector<8x128xf32>
    %87 = arith.mulf %86, %84 : vector<8x128xf32>
    %88 = arith.addf %83, %87 : vector<8x128xf32>
    %c64_i32 = arith.constant 64 : i32
    %89 = tpu.dynamic_rotate %23 by %c64_i32 dim 1 : vector<8x128xf32>, i32 -> vector<8x128xf32>
    %c12 = arith.constant 12 : index
    %c0_28 = arith.constant 0 : index
    %90 = vector.load %arg2[%c12, %c0_28] : memref<24x128xf32, #tpu.memory_space<vmem>>, vector<1x128xf32>
    %91 = vector.broadcast %90 : vector<1x128xf32> to vector<8x128xf32>
    %92 = arith.mulf %91, %89 : vector<8x128xf32>
    %93 = arith.addf %88, %92 : vector<8x128xf32>
    %c64_i32_29 = arith.constant 64 : i32
    %94 = tpu.dynamic_rotate %1 by %c64_i32_29 dim 1 : vector<8x128xf32>, i32 -> vector<8x128xf32>
    %c13 = arith.constant 13 : index
    %c0_30 = arith.constant 0 : index
    %95 = vector.load %arg2[%c13, %c0_30] : memref<24x128xf32, #tpu.memory_space<vmem>>, vector<1x128xf32>
    %96 = vector.broadcast %95 : vector<1x128xf32> to vector<8x128xf32>
    %97 = arith.mulf %96, %94 : vector<8x128xf32>
    %98 = arith.addf %93, %97 : vector<8x128xf32>
    %c64_i32_31 = arith.constant 64 : i32
    %99 = tpu.dynamic_rotate %28 by %c64_i32_31 dim 1 : vector<8x128xf32>, i32 -> vector<8x128xf32>
    %c14 = arith.constant 14 : index
    %c0_32 = arith.constant 0 : index
    %100 = vector.load %arg2[%c14, %c0_32] : memref<24x128xf32, #tpu.memory_space<vmem>>, vector<1x128xf32>
    %101 = vector.broadcast %100 : vector<1x128xf32> to vector<8x128xf32>
    %102 = arith.mulf %101, %99 : vector<8x128xf32>
    %103 = arith.addf %98, %102 : vector<8x128xf32>
    %c48_i32 = arith.constant 48 : i32
    %104 = tpu.dynamic_rotate %23 by %c48_i32 dim 1 : vector<8x128xf32>, i32 -> vector<8x128xf32>
    %c15 = arith.constant 15 : index
    %c0_33 = arith.constant 0 : index
    %105 = vector.load %arg2[%c15, %c0_33] : memref<24x128xf32, #tpu.memory_space<vmem>>, vector<1x128xf32>
    %106 = vector.broadcast %105 : vector<1x128xf32> to vector<8x128xf32>
    %107 = arith.mulf %106, %104 : vector<8x128xf32>
    %108 = arith.addf %103, %107 : vector<8x128xf32>
    %c48_i32_34 = arith.constant 48 : i32
    %109 = tpu.dynamic_rotate %1 by %c48_i32_34 dim 1 : vector<8x128xf32>, i32 -> vector<8x128xf32>
    %c16 = arith.constant 16 : index
    %c0_35 = arith.constant 0 : index
    %110 = vector.load %arg2[%c16, %c0_35] : memref<24x128xf32, #tpu.memory_space<vmem>>, vector<1x128xf32>
    %111 = vector.broadcast %110 : vector<1x128xf32> to vector<8x128xf32>
    %112 = arith.mulf %111, %109 : vector<8x128xf32>
    %113 = arith.addf %108, %112 : vector<8x128xf32>
    %c48_i32_36 = arith.constant 48 : i32
    %114 = tpu.dynamic_rotate %28 by %c48_i32_36 dim 1 : vector<8x128xf32>, i32 -> vector<8x128xf32>
    %c17 = arith.constant 17 : index
    %c0_37 = arith.constant 0 : index
    %115 = vector.load %arg2[%c17, %c0_37] : memref<24x128xf32, #tpu.memory_space<vmem>>, vector<1x128xf32>
    %116 = vector.broadcast %115 : vector<1x128xf32> to vector<8x128xf32>
    %117 = arith.mulf %116, %114 : vector<8x128xf32>
    %118 = arith.addf %113, %117 : vector<8x128xf32>
    %c32_i32 = arith.constant 32 : i32
    %119 = tpu.dynamic_rotate %23 by %c32_i32 dim 1 : vector<8x128xf32>, i32 -> vector<8x128xf32>
    %c18 = arith.constant 18 : index
    %c0_38 = arith.constant 0 : index
    %120 = vector.load %arg2[%c18, %c0_38] : memref<24x128xf32, #tpu.memory_space<vmem>>, vector<1x128xf32>
    %121 = vector.broadcast %120 : vector<1x128xf32> to vector<8x128xf32>
    %122 = arith.mulf %121, %119 : vector<8x128xf32>
    %123 = arith.addf %118, %122 : vector<8x128xf32>
    %c32_i32_39 = arith.constant 32 : i32
    %124 = tpu.dynamic_rotate %1 by %c32_i32_39 dim 1 : vector<8x128xf32>, i32 -> vector<8x128xf32>
    %c19 = arith.constant 19 : index
    %c0_40 = arith.constant 0 : index
    %125 = vector.load %arg2[%c19, %c0_40] : memref<24x128xf32, #tpu.memory_space<vmem>>, vector<1x128xf32>
    %126 = vector.broadcast %125 : vector<1x128xf32> to vector<8x128xf32>
    %127 = arith.mulf %126, %124 : vector<8x128xf32>
    %128 = arith.addf %123, %127 : vector<8x128xf32>
    %c32_i32_41 = arith.constant 32 : i32
    %129 = tpu.dynamic_rotate %28 by %c32_i32_41 dim 1 : vector<8x128xf32>, i32 -> vector<8x128xf32>
    %c20 = arith.constant 20 : index
    %c0_42 = arith.constant 0 : index
    %130 = vector.load %arg2[%c20, %c0_42] : memref<24x128xf32, #tpu.memory_space<vmem>>, vector<1x128xf32>
    %131 = vector.broadcast %130 : vector<1x128xf32> to vector<8x128xf32>
    %132 = arith.mulf %131, %129 : vector<8x128xf32>
    %133 = arith.addf %128, %132 : vector<8x128xf32>
    %c16_i32_43 = arith.constant 16 : i32
    %134 = tpu.dynamic_rotate %23 by %c16_i32_43 dim 1 : vector<8x128xf32>, i32 -> vector<8x128xf32>
    %c21 = arith.constant 21 : index
    %c0_44 = arith.constant 0 : index
    %135 = vector.load %arg2[%c21, %c0_44] : memref<24x128xf32, #tpu.memory_space<vmem>>, vector<1x128xf32>
    %136 = vector.broadcast %135 : vector<1x128xf32> to vector<8x128xf32>
    %137 = arith.mulf %136, %134 : vector<8x128xf32>
    %138 = arith.addf %133, %137 : vector<8x128xf32>
    %c16_i32_45 = arith.constant 16 : i32
    %139 = tpu.dynamic_rotate %1 by %c16_i32_45 dim 1 : vector<8x128xf32>, i32 -> vector<8x128xf32>
    %c22 = arith.constant 22 : index
    %c0_46 = arith.constant 0 : index
    %140 = vector.load %arg2[%c22, %c0_46] : memref<24x128xf32, #tpu.memory_space<vmem>>, vector<1x128xf32>
    %141 = vector.broadcast %140 : vector<1x128xf32> to vector<8x128xf32>
    %142 = arith.mulf %141, %139 : vector<8x128xf32>
    %143 = arith.addf %138, %142 : vector<8x128xf32>
    %c16_i32_47 = arith.constant 16 : i32
    %144 = tpu.dynamic_rotate %28 by %c16_i32_47 dim 1 : vector<8x128xf32>, i32 -> vector<8x128xf32>
    %c23 = arith.constant 23 : index
    %c0_48 = arith.constant 0 : index
    %145 = vector.load %arg2[%c23, %c0_48] : memref<24x128xf32, #tpu.memory_space<vmem>>, vector<1x128xf32>
    %146 = vector.broadcast %145 : vector<1x128xf32> to vector<8x128xf32>
    %147 = arith.mulf %146, %144 : vector<8x128xf32>
    %148 = arith.addf %143, %147 : vector<8x128xf32>
    %cst_49 = arith.constant 0.000000e+00 : f32
    %149 = vector.broadcast %cst_49 : f32 to vector<8x128xf32>
    %150 = arith.maximumf %148, %149 : vector<8x128xf32>
    %c0_i32_50 = arith.constant 0 : i32
    %151 = arith.addi %0, %c0_i32_50 : i32
    %152 = tpu.iota {dimensions = array<i32: 0>} : vector<8x128xi32>
    %153 = vector.broadcast %151 : i32 to vector<8x128xi32>
    %154 = arith.addi %153, %152 : vector<8x128xi32>
    %c2_i32 = arith.constant 2 : i32
    %155 = vector.broadcast %c2_i32 : i32 to vector<8x128xi32>
    %156 = arith.cmpi slt, %154, %155 : vector<8x128xi32>
    %cst_51 = arith.constant 0.000000e+00 : f32
    %157 = vector.broadcast %cst_51 : f32 to vector<8x128xf32>
    %158 = arith.select %156, %150, %157 : vector<8x128xi1>, vector<8x128xf32>
    %cst_52 = arith.constant dense<0.000000e+00> : vector<128xf32>
    %159 = vector.multi_reduction <add>, %158, %cst_52 [0] : vector<8x128xf32> to vector<128xf32>
    %160 = vector.shape_cast %159 : vector<128xf32> to vector<1x128xf32>
    %161 = arith.mulf %158, %158 : vector<8x128xf32>
    %cst_53 = arith.constant dense<0.000000e+00> : vector<128xf32>
    %162 = vector.multi_reduction <add>, %161, %cst_53 [0] : vector<8x128xf32> to vector<128xf32>
    %163 = vector.shape_cast %162 : vector<128xf32> to vector<1x128xf32>
    %c0_54 = arith.constant 0 : index
    %c0_55 = arith.constant 0 : index
    %164 = vector.load %arg4[%c0_54, %c0_55] : memref<8x128xf32, #tpu.memory_space<vmem>>, vector<8x128xf32>
    tpu.vector_store %arg4[%c0_54, %c0_55], %150 {strides = array<i32>} : memref<8x128xf32, #tpu.memory_space<vmem>>, vector<8x128xf32>,
    %c0_56 = arith.constant 0 : index
    %c0_57 = arith.constant 0 : index
    %c0_58 = arith.constant 0 : index
    %165 = vector.load %arg5[%c0_56, %c0_57, %c0_58] : memref<1x2x128xf32, #tpu.memory_space<vmem>>, vector<1x1x128xf32>
    %166 = vector.shape_cast %165 : vector<1x1x128xf32> to vector<1x128xf32>
    %167 = vector.shape_cast %160 : vector<1x128xf32> to vector<1x1x128xf32>
    tpu.vector_store %arg5[%c0_56, %c0_57, %c0_58], %167 {strides = array<i32>} : memref<1x2x128xf32, #tpu.memory_space<vmem>>, vector<1x1x128xf32>,
    %c0_59 = arith.constant 0 : index
    %c1_60 = arith.constant 1 : index
    %c0_61 = arith.constant 0 : index
    %168 = vector.load %arg5[%c0_59, %c1_60, %c0_61] : memref<1x2x128xf32, #tpu.memory_space<vmem>>, vector<1x1x128xf32>
    %169 = vector.shape_cast %168 : vector<1x1x128xf32> to vector<1x128xf32>
    %170 = vector.shape_cast %163 : vector<1x128xf32> to vector<1x1x128xf32>
    tpu.vector_store %arg5[%c0_59, %c1_60, %c0_61], %170 {strides = array<i32>} : memref<1x2x128xf32, #tpu.memory_space<vmem>>, vector<1x1x128xf32>,
    return
  }
  func.func @transform_0(%arg0: i32) -> (i32, i32) {
    %c0_i32 = arith.constant 0 : i32
    %c0_i32_0 = arith.constant 0 : i32
    return %arg0, %c0_i32 : i32, i32
  }
  func.func @transform_1(%arg0: i32) -> (i32, i32) {
    %c0_i32 = arith.constant 0 : i32
    %c0_i32_0 = arith.constant 0 : i32
    %c0_i32_1 = arith.constant 0 : i32
    return %c0_i32, %c0_i32_0 : i32, i32
  }
  func.func @transform_2(%arg0: i32) -> (i32, i32) {
    %c0_i32 = arith.constant 0 : i32
    %c0_i32_0 = arith.constant 0 : i32
    %c0_i32_1 = arith.constant 0 : i32
    return %c0_i32, %c0_i32_0 : i32, i32
  }
  func.func @transform_3(%arg0: i32) -> (i32, i32) {
    %c0_i32 = arith.constant 0 : i32
    %c0_i32_0 = arith.constant 0 : i32
    return %arg0, %c0_i32 : i32, i32
  }
  func.func @transform_4(%arg0: i32) -> (i32, i32, i32) {
    %c0_i32 = arith.constant 0 : i32
    %c0_i32_0 = arith.constant 0 : i32
    %c0_i32_1 = arith.constant 0 : i32
    return %arg0, %c0_i32, %c0_i32_0 : i32, i32, i32
  }
}

</mosaic_0001>

<bundles_post_ra>
// kernel: tpu_custom_call.1
= control target key start
LH: loop header
LB: loop body
LE: loop exit
PB: predicated region body
PF: predicated region fallthrough
CT: control target
= control target key end

     0   :  { %10 = vsyncpa [#allocation3], 0  ;;  %s523_s0 = inlined_call_operand.hbm [shape: f32[8,128], index: 0, kind: input, shape index: {}]   ;;  %s524_s1 = inlined_call_operand.hbm [shape: f32[24,128], index: 1, kind: input, shape index: {}]   ;;  %s525_s2 = inlined_call_operand.vmem [shape: f32[1,128], index: 2, kind: input, shape index: {}]   ;;  %s526_s3 = inlined_call_operand.hbm [shape: f32[8,128], index: 3, kind: output, shape index: {0}]   ;;  %s527_s4 = inlined_call_operand.hbm [shape: f32[1,2,128], index: 4, kind: output, shape index: {1}]  }
   0x1   :  { %11 = vsyncpa [#allocation6], 0 }
   0x2   :  { %12 = vsyncpa [#allocation4], 0 }
   0x3   :  { %13 = vsyncpa [#allocation9], 0  ;;  %s466_s15 = smov [#allocation2]   ;;  %s467_s17 = smov [#allocation5]  }
   0x4   :  { %s20_s16 = sshll.u32 %s466_s15, 4  ;;  %s29_s18 = sshll.u32 %s467_s17, 4  ;;  %s21_s16 = int_to_ptr.vmem [resolvable:$true] %s20_s16  ;;  %s30_s18 = int_to_ptr.vmem [resolvable:$true] %s29_s18 }
   0x5   :  { %s386_s19 = scalar_lea.vmem %s21_s16, 128  ;;  %p391_p1 = scmp.lt.s32.totalorder %s21_s16, %s21_s16 }
   0x6   :  { %p387_p0 = scmp.ne.s32.totalorder %s21_s16, %s386_s19  ;;  %p392_p2 = scmp.lt.s32.totalorder %s386_s19, %s386_s19 }
   0x8   :  { %p393_p3 = por %p392_p2, %p391_p1 }
   0xa   :  { %p394_p4 = pnand %p393_p3, %p387_p0 }
   0xc   :  { %397 = shalt.err (!%p394_p4)
}
   0xd   :  { %23 = dma.hbm_to_vmem [thread:$0]  %s523_s0, 128, %s21_s16, [#allocation3]  }
   0xe   :  { %s406_s22 = scalar_lea.vmem %s30_s18, 384  ;;  %p411_p6 = scmp.lt.s32.totalorder %s30_s18, %s30_s18 }
   0xf   :  { %p407_p5 = scmp.ne.s32.totalorder %s30_s18, %s406_s22  ;;  %p412_p7 = scmp.lt.s32.totalorder %s406_s22, %s406_s22 }
  0x11   :  { %p413_p8 = por %p412_p7, %p411_p6 }
  0x13   :  { %p414_p9 = pnand %p413_p8, %p407_p5 }
  0x15   :  { %417 = shalt.err (!%p414_p9)
}
  0x16   :  { %s468_s23 = smov 128   ;;  %s469_s24 = smov 8  }
  0x17   :  { %35 = dma.hbm_to_vmem [thread:$0]  %s524_s1, 384, %s30_s18, [#allocation6], %s468_s23, %s468_s23, %s469_s24  }
  0x18   :  { %458 = dma.done.wait [#allocation3], 128  }
  0x19   :  { %459 = vsyncadd [#allocation3], 4294967168 }
  0x1a   :  { %460 = dma.done.wait [#allocation6], 384  }
  0x1b   :  { %461 = vsyncadd [#allocation6], 4294966912  ;;  %v45_v0 = vld [vmem:[#allocation2] sm:$0xff]  ;;  %s470_s27 = smov 1   ;;  %s471_s0 = smov 127   ;;  %v46_v1 = vlaneseq }
  0x1c   :  { %61 = vrot.lane.b32.xlu0 %v45_v0, %s470_s27  ;;  %v339_v4 = vld [vmem:[#allocation5] ss:$0 sm:$0xff]  ;;  %v340_v5 = vld [vmem:[#allocation5 + $0x1] ss:$0 sm:$0xff]  ;;  %v338_v8 = vld [vmem:[%s525_s2] ss:$0 sm:$0xff] }
  0x1d   :  { %v47_v2 = vand.u32 127, %v46_v1  ;;  %s472_s29 = smov 112   ;;  %v87_v10 = vmul.f32 %v340_v5, %v45_v0  ;;  %v341_v11 = vld [vmem:[#allocation5 + $0x2] ss:$0 sm:$0xff]  ;;  %s473_s30 = smov 96  }
  0x1e   :  { %s474_s5 = smov 80   ;;  %s475_s2 = smov 64   ;;  %v342_v18 = vld [vmem:[#allocation5 + $0x3] ss:$0 sm:$0xff]  ;;  %v343_v21 = vld [vmem:[#allocation5 + $0x4] ss:$0 sm:$0xff] }
  0x1f   :  { %v52_v3 = vand.u32 15, %v47_v2  ;;  %s476_s6 = smov 48   ;;  %s477_s7 = smov 32   ;;  %v344_v22 = vld [vmem:[#allocation5 + $0x5] ss:$0 sm:$0xff] }
  0x20   :  { %65 = vrot.lane.b32.xlu0 %v45_v0, %s471_s0  ;;  %s478_s8 = smov 16   ;;  %v345_v28 = vld [vmem:[#allocation5 + $0x6] ss:$0 sm:$0xff]  ;;  %v346_v29 = vld [vmem:[#allocation5 + $0x7] ss:$0 sm:$0xff]  ;;  %s479_s9 = smov [#allocation7]  }
  0x21   :  { %vm60_vm0 = vcmp.eq.s32.totalorder %v52_v3, 0  ;;  %vm64_vm1 = vcmp.eq.s32.totalorder %v52_v3, 15  ;;  %v347_v36 = vld [vmem:[#allocation5 + $0x8] ss:$0 sm:$0xff]  ;;  %v348_v39 = vld [vmem:[#allocation5 + $0x9] ss:$0 sm:$0xff] }
  0x22   :  { %v349_v43 = vld [vmem:[#allocation5 + $0xa] ss:$0 sm:$0xff]  ;;  %v350_v47 = vld [vmem:[#allocation5 + $0xb] ss:$0 sm:$0xff]  ;;  %v351_v51 = vld [vmem:[#allocation5 + $0xc] ss:$0 sm:$0xff] }
  0x23   :  { %v352_v52 = vld [vmem:[#allocation5 + $0xd] ss:$0 sm:$0xff]  ;;  %v353_v60 = vld [vmem:[#allocation5 + $0xe] ss:$0 sm:$0xff]  ;;  %v354_v63 = vld [vmem:[#allocation5 + $0xf] ss:$0 sm:$0xff] }
  0x24   :  { %s314_s10 = sshll.u32 %s479_s9, 4  ;;  %s315_s10 = int_to_ptr.vmem [resolvable:$true] %s314_s10 }
  0x25   :  { %s418_s11 = scalar_lea.vmem %s315_s10, 128  ;;  %p423_p11 = scmp.lt.s32.totalorder %s315_s10, %s315_s10 }
  0x26   :  { %p419_p10 = scmp.ne.s32.totalorder %s315_s10, %s418_s11  ;;  %p424_p12 = scmp.lt.s32.totalorder %s418_s11, %s418_s11 }
  0x28   :  { %p425_p13 = por %p424_p12, %p423_p11 }
  0x2a   :  { %p426_p0 = pnand %p425_p13, %p419_p10 }
  0x8e   :  { %v62_v6 = vpop.permute.xlu0 %61 }
  0x8f   :  { %v63_v7 = vsel %vm60_vm0, 0.0, %v62_v6 }
  0x90   :  { %96 = vrot.lane.b32.xlu1 %v63_v7, %s472_s29  ;;  %v80_v9 = vmul.f32 %v339_v4, %v63_v7  ;;  %v355_v4 = vld [vmem:[#allocation5 + $0x10] ss:$0 sm:$0xff] }
  0x92   :  { %v66_v12 = vpop.permute.xlu0 %65  ;;  %v81_v13 = vadd.f32 %v338_v8, %v80_v9  ;;  %v356_v8 = vld [vmem:[#allocation5 + $0x11] ss:$0 sm:$0xff] }
  0x93   :  { %v67_v14 = vsel %vm64_vm1, 0.0, %v66_v12  ;;  %v357_v12 = vld [vmem:[#allocation5 + $0x12] ss:$0 sm:$0xff] }
  0x94   :  { %105 = vrot.lane.b32.xlu1 %v45_v0, %s472_s29  ;;  %114 = vrot.lane.b32.xlu0 %v67_v14, %s472_s29  ;;  %v88_v15 = vadd.f32 %v87_v10, %v81_v13  ;;  %v94_v16 = vmul.f32 %v341_v11, %v67_v14  ;;  %v358_v13 = vld [vmem:[#allocation5 + $0x13] ss:$0 sm:$0xff] }
  0x96   :  { %v95_v17 = vadd.f32 %v94_v16, %v88_v15 }
  0x98   :  { %123 = vrot.lane.b32.xlu1 %v63_v7, %s473_s30  ;;  %132 = vrot.lane.b32.xlu0 %v45_v0, %s473_s30 }
  0x9c   :  { %141 = vrot.lane.b32.xlu1 %v67_v14, %s473_s30  ;;  %150 = vrot.lane.b32.xlu0 %v63_v7, %s474_s5 }
  0xa0   :  { %159 = vrot.lane.b32.xlu1 %v45_v0, %s474_s5  ;;  %168 = vrot.lane.b32.xlu0 %v67_v14, %s474_s5 }
  0xa4   :  { %177 = vrot.lane.b32.xlu1 %v63_v7, %s475_s2  ;;  %186 = vrot.lane.b32.xlu0 %v45_v0, %s475_s2 }
  0xa8   :  { %195 = vrot.lane.b32.xlu1 %v67_v14, %s475_s2  ;;  %204 = vrot.lane.b32.xlu0 %v63_v7, %s476_s6 }
  0xac   :  { %213 = vrot.lane.b32.xlu1 %v45_v0, %s476_s6  ;;  %222 = vrot.lane.b32.xlu0 %v67_v14, %s476_s6 }
  0xb0   :  { %231 = vrot.lane.b32.xlu1 %v63_v7, %s477_s7  ;;  %240 = vrot.lane.b32.xlu0 %v45_v0, %s477_s7 }
  0xb4   :  { %249 = vrot.lane.b32.xlu1 %v67_v14, %s477_s7  ;;  %258 = vrot.lane.b32.xlu0 %v63_v7, %s478_s8 }
  0xb8   :  { %267 = vrot.lane.b32.xlu1 %v45_v0, %s478_s8  ;;  %276 = vrot.lane.b32.xlu0 %v67_v14, %s478_s8 }
 0x102   :  { %v97_v19 = vpop.permute.xlu1 %96 }
 0x103   :  { %v103_v20 = vmul.f32 %v342_v18, %v97_v19 }
 0x105   :  { %v104_v25 = vadd.f32 %v103_v20, %v95_v17 }
 0x106   :  { %v106_v23 = vpop.permute.xlu1 %105  ;;  %v115_v24 = vpop.permute.xlu0 %114 }
 0x107   :  { %v112_v26 = vmul.f32 %v343_v21, %v106_v23  ;;  %v121_v27 = vmul.f32 %v344_v22, %v115_v24  ;;  %v359_v21 = vld [vmem:[#allocation5 + $0x14] ss:$0 sm:$0xff]  ;;  %v360_v24 = vld [vmem:[#allocation5 + $0x15] ss:$0 sm:$0xff] }
 0x109   :  { %v113_v30 = vadd.f32 %v112_v26, %v104_v25 }
 0x10a   :  { %v124_v31 = vpop.permute.xlu1 %123  ;;  %v133_v32 = vpop.permute.xlu0 %132 }
 0x10b   :  { %v122_v33 = vadd.f32 %v121_v27, %v113_v30  ;;  %v130_v34 = vmul.f32 %v345_v28, %v124_v31  ;;  %v139_v35 = vmul.f32 %v346_v29, %v133_v32  ;;  %v361_v28 = vld [vmem:[#allocation5 + $0x16] ss:$0 sm:$0xff]  ;;  %v362_v32 = vld [vmem:[#allocation5 + $0x17] ss:$0 sm:$0xff] }
 0x10d   :  { %v131_v37 = vadd.f32 %v130_v34, %v122_v33 }
 0x10e   :  { %v142_v38 = vpop.permute.xlu1 %141  ;;  %v151_v40 = vpop.permute.xlu0 %150 }
 0x10f   :  { %v140_v41 = vadd.f32 %v139_v35, %v131_v37  ;;  %v148_v42 = vmul.f32 %v347_v36, %v142_v38  ;;  %v157_v45 = vmul.f32 %v348_v39, %v151_v40  ;;  %v287_v36 = vshrl.u32 %v46_v1, 7 }
 0x111   :  { %v149_v44 = vadd.f32 %v148_v42, %v140_v41  ;;  %vm290_vm2 = vcmp.lt.s32.totalorder %v287_v36, 2 }
 0x112   :  { %v160_v46 = vpop.permute.xlu1 %159  ;;  %v169_v48 = vpop.permute.xlu0 %168 }
 0x113   :  { %v158_v49 = vadd.f32 %v157_v45, %v149_v44  ;;  %v166_v50 = vmul.f32 %v349_v43, %v160_v46  ;;  %v175_v54 = vmul.f32 %v350_v47, %v169_v48 }
 0x115   :  { %v167_v53 = vadd.f32 %v166_v50, %v158_v49 }
 0x116   :  { %v178_v55 = vpop.permute.xlu1 %177  ;;  %v187_v56 = vpop.permute.xlu0 %186 }
 0x117   :  { %v176_v57 = vadd.f32 %v175_v54, %v167_v53  ;;  %v184_v58 = vmul.f32 %v351_v51, %v178_v55  ;;  %v193_v59 = vmul.f32 %v352_v52, %v187_v56 }
 0x119   :  { %v185_v61 = vadd.f32 %v184_v58, %v176_v57 }
 0x11a   :  { %v196_v62 = vpop.permute.xlu1 %195  ;;  %v205_v0 = vpop.permute.xlu0 %204 }
 0x11b   :  { %v194_v2 = vadd.f32 %v193_v59, %v185_v61  ;;  %v202_v3 = vmul.f32 %v353_v60, %v196_v62  ;;  %v211_v6 = vmul.f32 %v354_v63, %v205_v0 }
 0x11d   :  { %v203_v5 = vadd.f32 %v202_v3, %v194_v2 }
 0x11e   :  { %v214_v7 = vpop.permute.xlu1 %213  ;;  %v223_v9 = vpop.permute.xlu0 %222 }
 0x11f   :  { %v212_v10 = vadd.f32 %v211_v6, %v203_v5  ;;  %v220_v11 = vmul.f32 %v355_v4, %v214_v7  ;;  %v229_v15 = vmul.f32 %v356_v8, %v223_v9 }
 0x121   :  { %v221_v14 = vadd.f32 %v220_v11, %v212_v10 }
 0x122   :  { %v232_v16 = vpop.permute.xlu1 %231  ;;  %v241_v17 = vpop.permute.xlu0 %240 }
 0x123   :  { %v230_v18 = vadd.f32 %v229_v15, %v221_v14  ;;  %v238_v19 = vmul.f32 %v357_v12, %v232_v16  ;;  %v247_v20 = vmul.f32 %v358_v13, %v241_v17 }
 0x125   :  { %v239_v22 = vadd.f32 %v238_v19, %v230_v18 }
 0x126   :  { %v250_v23 = vpop.permute.xlu1 %249  ;;  %v259_v25 = vpop.permute.xlu0 %258 }
 0x127   :  { %v248_v26 = vadd.f32 %v247_v20, %v239_v22  ;;  %v256_v27 = vmul.f32 %v359_v21, %v250_v23  ;;  %v265_v30 = vmul.f32 %v360_v24, %v259_v25 }
 0x129   :  { %v257_v29 = vadd.f32 %v256_v27, %v248_v26 }
 0x12a   :  { %v268_v31 = vpop.permute.xlu1 %267  ;;  %v277_v33 = vpop.permute.xlu0 %276 }
 0x12b   :  { %v266_v34 = vadd.f32 %v265_v30, %v257_v29  ;;  %v274_v35 = vmul.f32 %v361_v28, %v268_v31  ;;  %v283_v38 = vmul.f32 %v362_v32, %v277_v33 }
 0x12d   :  { %v275_v37 = vadd.f32 %v274_v35, %v266_v34 }
 0x12f   :  { %v284_v39 = vadd.f32 %v283_v38, %v275_v37 }
 0x131   :  { %v285_v40 = vmax.f32 %v284_v39, 0.0 }
 0x133   :  { %v291_v41 = vsel %vm290_vm2, %v285_v40, 0.0  ;;  %305 = vst [vmem:[#allocation7] sm:$0xff] %v285_v40 }
 0x134   :  { %v292_v42 = vrot.slane %v291_v41, 4  ;;  %v298_v43 = vmul.f32 %v291_v41, %v291_v41 }
 0x135   :  { %429 = shalt.err (!%p426_p0)
}
 0x136   :  { %317 = dma.vmem_to_hbm [thread:$0]  %s315_s10, 128, %s526_s3, [#allocation4]   ;;  %v293_v1 = vadd.f32 %v292_v42, %v291_v41  ;;  %v299_v44 = vrot.slane %v298_v43, 4 }
 0x137   :  { %s480_s14 = smov [#allocation8]  }
 0x138   :  { %v294_v45 = vrot.slane %v293_v1, 2  ;;  %v300_v46 = vadd.f32 %v299_v44, %v298_v43  ;;  %s324_s15 = sshll.u32 %s480_s14, 4  ;;  %s325_s15 = int_to_ptr.vmem [resolvable:$true] %s324_s15 }
 0x139   :  { %s438_s16 = scalar_lea.vmem %s325_s15, 32  ;;  %p443_p2 = scmp.lt.s32.totalorder %s325_s15, %s325_s15 }
 0x13a   :  { %v295_v47 = vadd.f32 %v294_v45, %v293_v1  ;;  %v301_v48 = vrot.slane %v300_v46, 2  ;;  %p439_p1 = scmp.ne.s32.totalorder %s325_s15, %s438_s16  ;;  %p444_p3 = scmp.lt.s32.totalorder %s438_s16, %s438_s16 }
 0x13c   :  { %v296_v49 = vrot.slane %v295_v47, 1  ;;  %v302_v50 = vadd.f32 %v301_v48, %v300_v46  ;;  %p445_p4 = por %p444_p3, %p443_p2 }
 0x13e   :  { %v297_v51 = vadd.f32 %v296_v49, %v295_v47  ;;  %v303_v52 = vrot.slane %v302_v50, 1  ;;  %p446_p5 = pnand %p445_p4, %p439_p1 }
 0x140   :  { %v304_v53 = vadd.f32 %v303_v52, %v302_v50  ;;  %306 = vst [vmem:[#allocation8] sm:$0x1] %v297_v51 }
 0x142   :  { %307 = vst [vmem:[#allocation8 + $0x1] sm:$0x1] %v304_v53 }
 0x143   :  { %449 = shalt.err (!%p446_p5)
}
 0x144   :  { %327 = dma.vmem_to_hbm [thread:$0]  %s325_s15, 32, %s527_s4, [#allocation9]  }
 0x145   :  { %462 = dma.done.wait [#allocation4], 128  }
 0x146   :  { %463 = vsyncadd [#allocation4], 4294967168 }
 0x147   :  { %464 = dma.done.wait [#allocation9], 32  }
 0x148   :  { %465 = vsyncadd [#allocation9], 4294967264 }
 0x149   :  { %334 = vsyncpa [#allocation3], 1 }
 0x14a   :  { %335 = vsyncpa [#allocation6], 1 }
 0x14b   :  { %336 = vsyncpa [#allocation4], 1 }
 0x14c   :  { %337 = vsyncpa [#allocation9], 1 }

</bundles_post_ra>
